<compile_context>
chip_gen: v6e
topology: v6e:2x2x1
jax: 0.10.0
libtpu: 0.0.40
codegen_flags: <defaults>
</compile_context>

<pallas_src>
import jax
import jax.numpy as jnp
from jax import lax
from jax.experimental import pallas as pl
from jax.experimental.pallas import tpu as pltpu


def bottleneck_kernel(x_ref, w1_ref, s1_ref, b1_ref,
                      w2_ref, s2_ref, b2_ref,
                      w3_ref, s3_ref, b3_ref, out_ref):
    # x_ref  : (1, H, W, Cin)  full image (resident across the strip grid axis)
    # w1_ref : (Cin, P) bf16
    # w2_ref : (3, P, 3P) bf16  -- ky-major, kx taps concatenated on the out axis
    # w3_ref : (P, 4P) bf16
    # s*/b*  : (1, Cout) f32 folded BN scale / bias
    # out_ref: (1, TH, W, Cin)
    H = x_ref.shape[1]
    TH, W, Cin = out_ref.shape[1], out_ref.shape[2], out_ref.shape[3]
    P = w1_ref.shape[1]
    THW = TH * W

    s = pl.program_id(1)
    n_strips = pl.num_programs(1)
    row0 = s * TH

    # ---- strip + 1-row halo (leading-axis slices only, no relayout) ----------
    top_flat = x_ref[0, pl.ds(jnp.maximum(row0 - 1, 0), 1), :, :].reshape(W, Cin)
    mid_flat = x_ref[0, pl.ds(row0, TH), :, :].reshape(THW, Cin)      # f32, reused as residual
    bot_flat = x_ref[0, pl.ds(jnp.minimum(row0 + TH, H - 1), 1), :, :].reshape(W, Cin)

    # ---- conv1 (1x1) + bn1 + relu  (bf16 MXU operands, f32 accumulate) -------
    def c1(flat_f32):
        y = jnp.dot(flat_f32.astype(jnp.bfloat16), w1_ref[...],
                    preferred_element_type=jnp.float32)
        return jnp.maximum(y * s1_ref[...] + b1_ref[...], 0.0)

    # conv2's zero padding in H: halo rows that fall outside the image are zero.
    h_top = jnp.where(s > 0, c1(top_flat), 0.0).astype(jnp.bfloat16)           # (W, P)
    h_mid = c1(mid_flat).astype(jnp.bfloat16)                                  # (THW, P)
    h_bot = jnp.where(s < n_strips - 1, c1(bot_flat), 0.0).astype(jnp.bfloat16)
    h1 = jnp.concatenate([h_top, h_mid, h_bot], axis=0)        # ((TH+2)*W, P) bf16

    # ---- conv2 (3x3, pad=1, stride=1) + bn2 + relu ---------------------------
    # One (THW,P)x(P,3P) matmul per ky; sum over ky; then per-kx column shift.
    z = None
    for ky in range(3):
        slab = h1[ky * W: ky * W + THW]                         # aligned sublane slice
        d = jnp.dot(slab, w2_ref[ky], preferred_element_type=jnp.float32)
        z = d if z is None else z + d                           # (THW, 3P) f32

    left, center, right = z[:, :P], z[:, P:2 * P], z[:, 2 * P:]
    col = lax.broadcasted_iota(jnp.int32, (THW, 1), 0) % W      # column index
    acc = center
    # kx=0 tap needs column c-1: shift the matmul output down by one flat row;
    # wrapped / out-of-image values (c == 0) are zeroed by the edge mask.
    acc = acc + jnp.where(col != 0, pltpu.roll(left, shift=1, axis=0), 0.0)
    # kx=2 tap needs column c+1: circular shift up by one == shift of THW-1
    # (pltpu.roll requires a non-negative shift).
    acc = acc + jnp.where(col != W - 1, pltpu.roll(right, shift=THW - 1, axis=0), 0.0)
    h2 = jnp.maximum(acc * s2_ref[...] + b2_ref[...], 0.0).astype(jnp.bfloat16)

    # ---- conv3 (1x1) + bn3 + residual + relu ---------------------------------
    h3 = jnp.dot(h2, w3_ref[...], preferred_element_type=jnp.float32)
    h3 = h3 * s3_ref[...] + b3_ref[...]                         # (THW, 4P) f32
    out = jnp.maximum(h3 + mid_flat, 0.0)                       # residual reused, f32
    out_ref[...] = out.reshape(1, TH, W, Cin).astype(out_ref.dtype)


def _pick_strip(H, W):
    """Largest divisor of H giving >=4 strips of <=1024 output pixels, else >=2
    strips of <=2048 / <=4096 pixels, else the whole image (single strip).
    >=2 strips keeps both v7x TensorCores busy; larger strips amortize per-step
    overhead on single-TC v5e/v6e."""
    divs = [d for d in range(1, H + 1) if H % d == 0]
    for min_strips, max_pix in ((4, 1024), (2, 2048), (2, 4096)):
        cand = [d for d in divs if H // d >= min_strips and d * W <= max_pix]
        if cand:
            return max(cand)
    return H


def _vmem_cap_bytes():
    # ~0.75x of physical VMEM leaves headroom for Mosaic internal scratch and
    # semaphores (v7x has only 64 MiB per TC). Fallback if query unavailable.
    try:
        return (pltpu.get_tpu_info().vmem_capacity_bytes * 3) // 4
    except Exception:
        return 48 * 1024 * 1024


def bottleneck_pallas(x_nhwc, w1, s1, b1, w2, s2, b2, w3, s3, b3, *, strip=None):
    N, H, W, Cin = x_nhwc.shape
    P = w1.shape[1]
    assert Cin == 4 * P, "stride=1 / no down_sample requires in_planes == planes*4"
    # TODO(synk): W % 8 != 0 (e.g. ResNet 28/14/7 stages) needs W padding for
    # aligned sublane slices; not handled in this kernel.
    assert W % 8 == 0

    th = _pick_strip(H, W) if strip is None else strip
    assert H % th == 0
    n_strips = H // th

    # bf16 weights: MXU-native matmul operands, halves weight DMA. BN consts stay f32.
    w1 = w1.astype(jnp.bfloat16)
    w3 = w3.astype(jnp.bfloat16)
    # Fuse conv2's kx taps into the matmul RHS: (ky, kx, P, P) -> (ky, P, 3P).
    w2f = jnp.concatenate([w2[:, 0], w2[:, 1], w2[:, 2]], axis=-1).astype(jnp.bfloat16)

    # Shape-aware VMEM estimate: double-buffered x / out blocks, resident weights,
    # per-strip intermediates; 1.5x safety factor, capped below physical VMEM.
    f32b, bf16b = 4, 2
    est = 2 * (H * W * Cin + th * W * Cin) * f32b
    est += 2 * ((Cin * P + 3 * P * 3 * P + P * 4 * P) * bf16b + 6 * 4 * P * f32b)
    est += (th + 2) * W * P * (f32b + bf16b)                  # conv1 pieces + bf16 h1
    est += th * W * (3 * P + 3 * P + 4 * P + Cin) * f32b      # z/acc, h2, h3, out
    vmem_limit = int(min(_vmem_cap_bytes(), max(32 * 1024 * 1024, int(est * 1.5))))
    # TODO(synk): very large H*W*Cin can exceed the cap (full-image x residency);
    # that regime needs per-strip halo DMA instead of a resident x block.

    const = lambda a: pl.BlockSpec(a.shape, lambda n, s: (0,) * a.ndim)

    return pl.pallas_call(
        bottleneck_kernel,
        out_shape=jax.ShapeDtypeStruct((N, H, W, Cin), jnp.float32),
        grid_spec=pltpu.PrefetchScalarGridSpec(
            num_scalar_prefetch=0,
            grid=(N, n_strips),
            in_specs=[
                # x: full image block; block index does not depend on the strip
                # axis, so it stays resident across strips of the same image.
                pl.BlockSpec((1, H, W, Cin), lambda n, s: (n, 0, 0, 0)),
                const(w1), const(s1), const(b1),
                const(w2f), const(s2), const(b2),
                const(w3), const(s3), const(b3),
            ],
            out_specs=pl.BlockSpec((1, th, W, Cin), lambda n, s: (n, s, 0, 0)),
        ),
        compiler_params=pltpu.CompilerParams(
            dimension_semantics=("parallel", "parallel"),
            vmem_limit_bytes=vmem_limit),
    )(x_nhwc, w1, s1, b1, w2f, s2, b2, w3, s3, b3)


# ---------------- parameter construction (deterministic) ----------------

def make_params(key, in_planes, planes, eps=1e-5):
    exp = 4
    ks = jax.random.split(key, 15)
    w1_oihw = jax.random.normal(ks[0], (planes, in_planes, 1, 1), jnp.float32) * 0.1
    w2_oihw = jax.random.normal(ks[1], (planes, planes, 3, 3), jnp.float32) * 0.1
    w3_oihw = jax.random.normal(ks[2], (planes * exp, planes, 1, 1), jnp.float32) * 0.1

    def bn(kg, kb, km, kv, c):
        gamma = jax.random.normal(kg, (c,), jnp.float32) * 0.1 + 1.0
        beta = jax.random.normal(kb, (c,), jnp.float32) * 0.1
        mean = jax.random.normal(km, (c,), jnp.float32) * 0.1
        var = jax.random.uniform(kv, (c,), jnp.float32, minval=0.5, maxval=1.5)
        return gamma, beta, mean, var

    bn1 = bn(ks[3], ks[4], ks[5], ks[6], planes)
    bn2 = bn(ks[7], ks[8], ks[9], ks[10], planes)
    bn3 = bn(ks[11], ks[12], ks[13], ks[14], planes * exp)

    def fold(gamma, beta, mean, var):
        scale = gamma / jnp.sqrt(var + eps)
        return scale.reshape(1, -1), (beta - mean * scale).reshape(1, -1)

    s1, b1 = fold(*bn1)
    s2, b2 = fold(*bn2)
    s3, b3 = fold(*bn3)

    # kernel-friendly weight layouts
    w1 = w1_oihw[:, :, 0, 0].T                   # (Cin, P)
    w2 = jnp.transpose(w2_oihw, (2, 3, 1, 0))    # (ky, kx, in, out)
    w3 = w3_oihw[:, :, 0, 0].T                   # (P, 4P)

    torch_params = dict(w1=w1_oihw, w2=w2_oihw, w3=w3_oihw,
                        bn1=bn1, bn2=bn2, bn3=bn3, eps=eps)
    kern_params = (w1, s1, b1, w2, s2, b2, w3, s3, b3)
    return torch_params, kern_params


# ---------------- pure-JAX reference (mimics the PyTorch forward) --------

def ref_forward(x_nchw, tp):
    eps = tp["eps"]

    def conv(x, w, stride, pad):
        return lax.conv_general_dilated(
            x, w, (stride, stride), pad,
            dimension_numbers=("NCHW", "OIHW", "NCHW"))

    def bn(x, params):
        gamma, beta, mean, var = params
        sh = (1, -1, 1, 1)
        return (x - mean.reshape(sh)) / jnp.sqrt(var.reshape(sh) + eps) \
            * gamma.reshape(sh) + beta.reshape(sh)

    relu = lambda x: jnp.maximum(x, 0.0)

    identity = x_nchw
    out = relu(bn(conv(x_nchw, tp["w1"], 1, [(0, 0), (0, 0)]), tp["bn1"]))
    out = relu(bn(conv(out, tp["w2"], 1, [(1, 1), (1, 1)]), tp["bn2"]))
    out = bn(conv(out, tp["w3"], 1, [(0, 0), (0, 0)]), tp["bn3"])
    out = out + identity
    return relu(out)


if __name__ == "__main__":
    key = jax.random.PRNGKey(0)
    k_x, k_p = jax.random.split(key)

    # small shapes consistent with Bottleneck (in_planes = planes * 4)
    N, in_planes, H, W = 2, 16, 16, 16
    planes = 4

    x_nchw = jax.random.normal(k_x, (N, in_planes, H, W), jnp.float32)
    torch_params, kern_params = make_params(k_p, in_planes, planes)

    # Pallas path (NHWC)
    x_nhwc = jnp.transpose(x_nchw, (0, 2, 3, 1))
    out_nhwc = bottleneck_pallas(x_nhwc, *kern_params)
    out_nchw = jnp.transpose(out_nhwc, (0, 3, 1, 2))
    jax.block_until_ready(out_nchw)

    # Reference check (bf16 MXU operands with f32 accumulation -> loosened tol)
    ref = ref_forward(x_nchw, torch_params)
    assert out_nchw.shape == ref.shape == (N, in_planes, H, W)
    err = float(jnp.max(jnp.abs(out_nchw - ref)))
    assert jnp.allclose(out_nchw, ref, rtol=5e-2, atol=5e-2), f"max abs err {err}"
    print("KERNEL_OK")
</pallas_src>

<mosaic_0001>
module attributes {stable_mosaic.version = 11 : i64} {
  func.func @bottleneck_kernel(%arg0: i32, %arg1: i32, %arg2: memref<1x16x16x16xf32, #tpu.memory_space<vmem>>, %arg3: memref<16x4xbf16, #tpu.memory_space<vmem>>, %arg4: memref<1x4xf32, #tpu.memory_space<vmem>>, %arg5: memref<1x4xf32, #tpu.memory_space<vmem>>, %arg6: memref<3x4x12xbf16, #tpu.memory_space<vmem>>, %arg7: memref<1x4xf32, #tpu.memory_space<vmem>>, %arg8: memref<1x4xf32, #tpu.memory_space<vmem>>, %arg9: memref<4x16xbf16, #tpu.memory_space<vmem>>, %arg10: memref<1x16xf32, #tpu.memory_space<vmem>>, %arg11: memref<1x16xf32, #tpu.memory_space<vmem>>, %arg12: memref<1x4x16x16xf32, #tpu.memory_space<vmem>>) attributes {dimension_semantics = [#tpu.dimension_semantics<parallel>, #tpu.dimension_semantics<parallel>], iteration_bounds = array<i64: 2, 4>, scalar_prefetch = 0 : i64, scratch_operands = 0 : i64, tpu.core_type = #tpu.core_type<tc>, window_params = [{transform_indices = @transform_0, window_bounds = array<i64: 1, 16, 16, 16>}, {pipeline_mode = #tpu.pipeline_mode<synchronous>, transform_indices = @transform_1, window_bounds = array<i64: 16, 4>}, {pipeline_mode = #tpu.pipeline_mode<synchronous>, transform_indices = @transform_2, window_bounds = array<i64: 1, 4>}, {pipeline_mode = #tpu.pipeline_mode<synchronous>, transform_indices = @transform_3, window_bounds = array<i64: 1, 4>}, {pipeline_mode = #tpu.pipeline_mode<synchronous>, transform_indices = @transform_4, window_bounds = array<i64: 3, 4, 12>}, {pipeline_mode = #tpu.pipeline_mode<synchronous>, transform_indices = @transform_5, window_bounds = array<i64: 1, 4>}, {pipeline_mode = #tpu.pipeline_mode<synchronous>, transform_indices = @transform_6, window_bounds = array<i64: 1, 4>}, {pipeline_mode = #tpu.pipeline_mode<synchronous>, transform_indices = @transform_7, window_bounds = array<i64: 4, 16>}, {pipeline_mode = #tpu.pipeline_mode<synchronous>, transform_indices = @transform_8, window_bounds = array<i64: 1, 16>}, {pipeline_mode = #tpu.pipeline_mode<synchronous>, transform_indices = @transform_9, window_bounds = array<i64: 1, 16>}, {transform_indices = @transform_10, window_bounds = array<i64: 1, 4, 16, 16>}]} {
    %c4_i32 = arith.constant 4 : i32
    %0 = arith.muli %arg1, %c4_i32 : i32
    %c1_i32 = arith.constant 1 : i32
    %1 = arith.subi %0, %c1_i32 : i32
    %c0_i32 = arith.constant 0 : i32
    %2 = arith.maxsi %1, %c0_i32 : i32
    %c0 = arith.constant 0 : index
    %3 = arith.index_cast %2 : i32 to index
    %c0_0 = arith.constant 0 : index
    %c0_1 = arith.constant 0 : index
    %4 = vector.load %arg2[%c0, %3, %c0_0, %c0_1] : memref<1x16x16x16xf32, #tpu.memory_space<vmem>>, vector<1x1x16x16xf32>
    %5 = vector.shape_cast %4 : vector<1x1x16x16xf32> to vector<1x16x16xf32>
    %6 = vector.shape_cast %5 : vector<1x16x16xf32> to vector<16x16xf32>
    %c0_2 = arith.constant 0 : index
    %7 = arith.index_cast %0 : i32 to index
    %c0_3 = arith.constant 0 : index
    %c0_4 = arith.constant 0 : index
    %8 = vector.load %arg2[%c0_2, %7, %c0_3, %c0_4] : memref<1x16x16x16xf32, #tpu.memory_space<vmem>>, vector<1x4x16x16xf32>
    %9 = vector.shape_cast %8 : vector<1x4x16x16xf32> to vector<4x16x16xf32>
    %10 = vector.shape_cast %9 : vector<4x16x16xf32> to vector<64x16xf32>
    %c4_i32_5 = arith.constant 4 : i32
    %11 = arith.addi %0, %c4_i32_5 : i32
    %c15_i32 = arith.constant 15 : i32
    %12 = arith.minsi %11, %c15_i32 : i32
    %c0_6 = arith.constant 0 : index
    %13 = arith.index_cast %12 : i32 to index
    %c0_7 = arith.constant 0 : index
    %c0_8 = arith.constant 0 : index
    %14 = vector.load %arg2[%c0_6, %13, %c0_7, %c0_8] : memref<1x16x16x16xf32, #tpu.memory_space<vmem>>, vector<1x1x16x16xf32>
    %15 = vector.shape_cast %14 : vector<1x1x16x16xf32> to vector<1x16x16xf32>
    %16 = vector.shape_cast %15 : vector<1x16x16xf32> to vector<16x16xf32>
    %c0_i32_9 = arith.constant 0 : i32
    %17 = arith.cmpi sgt, %arg1, %c0_i32_9 : i32
    %18 = arith.truncf %6 : vector<16x16xf32> to vector<16x16xbf16>
    %c0_10 = arith.constant 0 : index
    %c0_11 = arith.constant 0 : index
    %19 = vector.load %arg3[%c0_10, %c0_11] : memref<16x4xbf16, #tpu.memory_space<vmem>>, vector<16x4xbf16>
    %cst = arith.constant dense<0.000000e+00> : vector<16x4xf32>
    %20 = tpu.matmul %18, %19, %cst {dimension_numbers = #tpu.dot_dimension_numbers<[1], [0], [0], [1], [0, 0, 1, 1], [], []>} : vector<16x16xbf16>, vector<16x4xbf16>, vector<16x4xf32> -> vector<16x4xf32>
    %c0_12 = arith.constant 0 : index
    %c0_13 = arith.constant 0 : index
    %21 = vector.load %arg4[%c0_12, %c0_13] : memref<1x4xf32, #tpu.memory_space<vmem>>, vector<1x4xf32>
    %22 = vector.broadcast %21 : vector<1x4xf32> to vector<16x4xf32>
    %23 = arith.mulf %20, %22 : vector<16x4xf32>
    %c0_14 = arith.constant 0 : index
    %c0_15 = arith.constant 0 : index
    %24 = vector.load %arg5[%c0_14, %c0_15] : memref<1x4xf32, #tpu.memory_space<vmem>>, vector<1x4xf32>
    %25 = vector.broadcast %24 : vector<1x4xf32> to vector<16x4xf32>
    %26 = arith.addf %23, %25 : vector<16x4xf32>
    %cst_16 = arith.constant 0.000000e+00 : f32
    %27 = vector.broadcast %cst_16 : f32 to vector<16x4xf32>
    %28 = arith.maximumf %26, %27 : vector<16x4xf32>
    %cst_17 = arith.constant 0.000000e+00 : f32
    %29 = vector.broadcast %cst_17 : f32 to vector<16x4xf32>
    %30 = arith.select %17, %28, %29 : vector<16x4xf32>
    %31 = arith.truncf %30 : vector<16x4xf32> to vector<16x4xbf16>
    %32 = arith.truncf %10 : vector<64x16xf32> to vector<64x16xbf16>
    %c0_18 = arith.constant 0 : index
    %c0_19 = arith.constant 0 : index
    %33 = vector.load %arg3[%c0_18, %c0_19] : memref<16x4xbf16, #tpu.memory_space<vmem>>, vector<16x4xbf16>
    %cst_20 = arith.constant dense<0.000000e+00> : vector<64x4xf32>
    %34 = tpu.matmul %32, %33, %cst_20 {dimension_numbers = #tpu.dot_dimension_numbers<[1], [0], [0], [1], [0, 0, 1, 1], [], []>} : vector<64x16xbf16>, vector<16x4xbf16>, vector<64x4xf32> -> vector<64x4xf32>
    %c0_21 = arith.constant 0 : index
    %c0_22 = arith.constant 0 : index
    %35 = vector.load %arg4[%c0_21, %c0_22] : memref<1x4xf32, #tpu.memory_space<vmem>>, vector<1x4xf32>
    %36 = vector.broadcast %35 : vector<1x4xf32> to vector<64x4xf32>
    %37 = arith.mulf %34, %36 : vector<64x4xf32>
    %c0_23 = arith.constant 0 : index
    %c0_24 = arith.constant 0 : index
    %38 = vector.load %arg5[%c0_23, %c0_24] : memref<1x4xf32, #tpu.memory_space<vmem>>, vector<1x4xf32>
    %39 = vector.broadcast %38 : vector<1x4xf32> to vector<64x4xf32>
    %40 = arith.addf %37, %39 : vector<64x4xf32>
    %cst_25 = arith.constant 0.000000e+00 : f32
    %41 = vector.broadcast %cst_25 : f32 to vector<64x4xf32>
    %42 = arith.maximumf %40, %41 : vector<64x4xf32>
    %43 = arith.truncf %42 : vector<64x4xf32> to vector<64x4xbf16>
    %c3_i32 = arith.constant 3 : i32
    %44 = arith.cmpi slt, %arg1, %c3_i32 : i32
    %45 = arith.truncf %16 : vector<16x16xf32> to vector<16x16xbf16>
    %c0_26 = arith.constant 0 : index
    %c0_27 = arith.constant 0 : index
    %46 = vector.load %arg3[%c0_26, %c0_27] : memref<16x4xbf16, #tpu.memory_space<vmem>>, vector<16x4xbf16>
    %cst_28 = arith.constant dense<0.000000e+00> : vector<16x4xf32>
    %47 = tpu.matmul %45, %46, %cst_28 {dimension_numbers = #tpu.dot_dimension_numbers<[1], [0], [0], [1], [0, 0, 1, 1], [], []>} : vector<16x16xbf16>, vector<16x4xbf16>, vector<16x4xf32> -> vector<16x4xf32>
    %c0_29 = arith.constant 0 : index
    %c0_30 = arith.constant 0 : index
    %48 = vector.load %arg4[%c0_29, %c0_30] : memref<1x4xf32, #tpu.memory_space<vmem>>, vector<1x4xf32>
    %49 = vector.broadcast %48 : vector<1x4xf32> to vector<16x4xf32>
    %50 = arith.mulf %47, %49 : vector<16x4xf32>
    %c0_31 = arith.constant 0 : index
    %c0_32 = arith.constant 0 : index
    %51 = vector.load %arg5[%c0_31, %c0_32] : memref<1x4xf32, #tpu.memory_space<vmem>>, vector<1x4xf32>
    %52 = vector.broadcast %51 : vector<1x4xf32> to vector<16x4xf32>
    %53 = arith.addf %50, %52 : vector<16x4xf32>
    %cst_33 = arith.constant 0.000000e+00 : f32
    %54 = vector.broadcast %cst_33 : f32 to vector<16x4xf32>
    %55 = arith.maximumf %53, %54 : vector<16x4xf32>
    %cst_34 = arith.constant 0.000000e+00 : f32
    %56 = vector.broadcast %cst_34 : f32 to vector<16x4xf32>
    %57 = arith.select %44, %55, %56 : vector<16x4xf32>
    %58 = arith.truncf %57 : vector<16x4xf32> to vector<16x4xbf16>
    %59 = tpu.concatenate %31, %43, %58 in 0 : vector<16x4xbf16>, vector<64x4xbf16>, vector<16x4xbf16> -> vector<96x4xbf16>
    %60 = vector.extract_strided_slice %59 {offsets = [0, 0], sizes = [64, 4], strides = [1, 1]} : vector<96x4xbf16> to vector<64x4xbf16>
    %c0_35 = arith.constant 0 : index
    %c0_36 = arith.constant 0 : index
    %c0_37 = arith.constant 0 : index
    %61 = vector.load %arg6[%c0_35, %c0_36, %c0_37] : memref<3x4x12xbf16, #tpu.memory_space<vmem>>, vector<1x4x12xbf16>
    %62 = vector.shape_cast %61 : vector<1x4x12xbf16> to vector<4x12xbf16>
    %cst_38 = arith.constant dense<0.000000e+00> : vector<64x12xf32>
    %63 = tpu.matmul %60, %62, %cst_38 {dimension_numbers = #tpu.dot_dimension_numbers<[1], [0], [0], [1], [0, 0, 1, 1], [], []>} : vector<64x4xbf16>, vector<4x12xbf16>, vector<64x12xf32> -> vector<64x12xf32>
    %64 = vector.extract_strided_slice %59 {offsets = [16, 0], sizes = [64, 4], strides = [1, 1]} : vector<96x4xbf16> to vector<64x4xbf16>
    %c1 = arith.constant 1 : index
    %c0_39 = arith.constant 0 : index
    %c0_40 = arith.constant 0 : index
    %65 = vector.load %arg6[%c1, %c0_39, %c0_40] : memref<3x4x12xbf16, #tpu.memory_space<vmem>>, vector<1x4x12xbf16>
    %66 = vector.shape_cast %65 : vector<1x4x12xbf16> to vector<4x12xbf16>
    %cst_41 = arith.constant dense<0.000000e+00> : vector<64x12xf32>
    %67 = tpu.matmul %64, %66, %cst_41 {dimension_numbers = #tpu.dot_dimension_numbers<[1], [0], [0], [1], [0, 0, 1, 1], [], []>} : vector<64x4xbf16>, vector<4x12xbf16>, vector<64x12xf32> -> vector<64x12xf32>
    %68 = arith.addf %63, %67 : vector<64x12xf32>
    %69 = vector.extract_strided_slice %59 {offsets = [32, 0], sizes = [64, 4], strides = [1, 1]} : vector<96x4xbf16> to vector<64x4xbf16>
    %c2 = arith.constant 2 : index
    %c0_42 = arith.constant 0 : index
    %c0_43 = arith.constant 0 : index
    %70 = vector.load %arg6[%c2, %c0_42, %c0_43] : memref<3x4x12xbf16, #tpu.memory_space<vmem>>, vector<1x4x12xbf16>
    %71 = vector.shape_cast %70 : vector<1x4x12xbf16> to vector<4x12xbf16>
    %cst_44 = arith.constant dense<0.000000e+00> : vector<64x12xf32>
    %72 = tpu.matmul %69, %71, %cst_44 {dimension_numbers = #tpu.dot_dimension_numbers<[1], [0], [0], [1], [0, 0, 1, 1], [], []>} : vector<64x4xbf16>, vector<4x12xbf16>, vector<64x12xf32> -> vector<64x12xf32>
    %73 = arith.addf %68, %72 : vector<64x12xf32>
    %74 = vector.extract_strided_slice %73 {offsets = [0, 0], sizes = [64, 4], strides = [1, 1]} : vector<64x12xf32> to vector<64x4xf32>
    %75 = vector.extract_strided_slice %73 {offsets = [0, 4], sizes = [64, 4], strides = [1, 1]} : vector<64x12xf32> to vector<64x4xf32>
    %76 = vector.extract_strided_slice %73 {offsets = [0, 8], sizes = [64, 4], strides = [1, 1]} : vector<64x12xf32> to vector<64x4xf32>
    %77 = tpu.iota {dimensions = array<i32: 0>} : vector<64x1xi32>
    %c16_i32 = arith.constant 16 : i32
    %c0_i32_45 = arith.constant 0 : i32
    %78 = arith.cmpi eq, %c16_i32, %c0_i32_45 : i32
    %c1_i32_46 = arith.constant 1 : i32
    %79 = arith.select %78, %c1_i32_46, %c16_i32 : i32
    %80 = vector.broadcast %79 : i32 to vector<64x1xi32>
    %81 = arith.remsi %77, %80 : vector<64x1xi32>
    %c0_i32_47 = arith.constant 0 : i32
    %82 = vector.broadcast %c0_i32_47 : i32 to vector<64x1xi32>
    %83 = arith.cmpi ne, %81, %82 : vector<64x1xi32>
    %c0_i32_48 = arith.constant 0 : i32
    %84 = vector.broadcast %c0_i32_48 : i32 to vector<64x1xi32>
    %85 = arith.cmpi slt, %81, %84 : vector<64x1xi32>
    %c0_i32_49 = arith.constant 0 : i32
    %86 = arith.cmpi slt, %79, %c0_i32_49 : i32
    %87 = vector.broadcast %86 : i1 to vector<64x1xi1>
    %88 = vector.broadcast %87 : vector<64x1xi1> to vector<64x1xi1>
    %89 = arith.xori %85, %88 : vector<64x1xi1>
    %90 = arith.andi %89, %83 : vector<64x1xi1>
    %91 = vector.broadcast %79 : i32 to vector<64x1xi32>
    %92 = arith.addi %81, %91 : vector<64x1xi32>
    %93 = arith.select %90, %92, %81 : vector<64x1xi1>, vector<64x1xi32>
    %c0_i32_50 = arith.constant 0 : i32
    %94 = vector.broadcast %c0_i32_50 : i32 to vector<64x1xi32>
    %95 = arith.cmpi ne, %93, %94 : vector<64x1xi32>
    %c1_i32_51 = arith.constant 1 : i32
    %96 = tpu.dynamic_rotate %74 by %c1_i32_51 dim 0 : vector<64x4xf32>, i32 -> vector<64x4xf32>
    %cst_52 = arith.constant 0.000000e+00 : f32
    %97 = vector.shape_cast %95 : vector<64x1xi1> to vector<64x1xi1>
    %98 = vector.broadcast %97 : vector<64x1xi1> to vector<64x4xi1>
    %99 = vector.broadcast %cst_52 : f32 to vector<64x4xf32>
    %100 = arith.select %98, %96, %99 : vector<64x4xi1>, vector<64x4xf32>
    %101 = arith.addf %75, %100 : vector<64x4xf32>
    %c15_i32_53 = arith.constant 15 : i32
    %102 = vector.broadcast %c15_i32_53 : i32 to vector<64x1xi32>
    %103 = arith.cmpi ne, %93, %102 : vector<64x1xi32>
    %c63_i32 = arith.constant 63 : i32
    %104 = tpu.dynamic_rotate %76 by %c63_i32 dim 0 : vector<64x4xf32>, i32 -> vector<64x4xf32>
    %cst_54 = arith.constant 0.000000e+00 : f32
    %105 = vector.shape_cast %103 : vector<64x1xi1> to vector<64x1xi1>
    %106 = vector.broadcast %105 : vector<64x1xi1> to vector<64x4xi1>
    %107 = vector.broadcast %cst_54 : f32 to vector<64x4xf32>
    %108 = arith.select %106, %104, %107 : vector<64x4xi1>, vector<64x4xf32>
    %109 = arith.addf %101, %108 : vector<64x4xf32>
    %c0_55 = arith.constant 0 : index
    %c0_56 = arith.constant 0 : index
    %110 = vector.load %arg7[%c0_55, %c0_56] : memref<1x4xf32, #tpu.memory_space<vmem>>, vector<1x4xf32>
    %111 = vector.broadcast %110 : vector<1x4xf32> to vector<64x4xf32>
    %112 = arith.mulf %109, %111 : vector<64x4xf32>
    %c0_57 = arith.constant 0 : index
    %c0_58 = arith.constant 0 : index
    %113 = vector.load %arg8[%c0_57, %c0_58] : memref<1x4xf32, #tpu.memory_space<vmem>>, vector<1x4xf32>
    %114 = vector.broadcast %113 : vector<1x4xf32> to vector<64x4xf32>
    %115 = arith.addf %112, %114 : vector<64x4xf32>
    %cst_59 = arith.constant 0.000000e+00 : f32
    %116 = vector.broadcast %cst_59 : f32 to vector<64x4xf32>
    %117 = arith.maximumf %115, %116 : vector<64x4xf32>
    %118 = arith.truncf %117 : vector<64x4xf32> to vector<64x4xbf16>
    %c0_60 = arith.constant 0 : index
    %c0_61 = arith.constant 0 : index
    %119 = vector.load %arg9[%c0_60, %c0_61] : memref<4x16xbf16, #tpu.memory_space<vmem>>, vector<4x16xbf16>
    %cst_62 = arith.constant dense<0.000000e+00> : vector<64x16xf32>
    %120 = tpu.matmul %118, %119, %cst_62 {dimension_numbers = #tpu.dot_dimension_numbers<[1], [0], [0], [1], [0, 0, 1, 1], [], []>} : vector<64x4xbf16>, vector<4x16xbf16>, vector<64x16xf32> -> vector<64x16xf32>
    %c0_63 = arith.constant 0 : index
    %c0_64 = arith.constant 0 : index
    %121 = vector.load %arg10[%c0_63, %c0_64] : memref<1x16xf32, #tpu.memory_space<vmem>>, vector<1x16xf32>
    %122 = vector.broadcast %121 : vector<1x16xf32> to vector<64x16xf32>
    %123 = arith.mulf %120, %122 : vector<64x16xf32>
    %c0_65 = arith.constant 0 : index
    %c0_66 = arith.constant 0 : index
    %124 = vector.load %arg11[%c0_65, %c0_66] : memref<1x16xf32, #tpu.memory_space<vmem>>, vector<1x16xf32>
    %125 = vector.broadcast %124 : vector<1x16xf32> to vector<64x16xf32>
    %126 = arith.addf %123, %125 : vector<64x16xf32>
    %127 = arith.addf %126, %10 : vector<64x16xf32>
    %cst_67 = arith.constant 0.000000e+00 : f32
    %128 = vector.broadcast %cst_67 : f32 to vector<64x16xf32>
    %129 = arith.maximumf %127, %128 : vector<64x16xf32>
    %130 = vector.shape_cast %129 : vector<64x16xf32> to vector<1x4x16x16xf32>
    %c0_68 = arith.constant 0 : index
    %c0_69 = arith.constant 0 : index
    %c0_70 = arith.constant 0 : index
    %c0_71 = arith.constant 0 : index
    %131 = vector.load %arg12[%c0_68, %c0_69, %c0_70, %c0_71] : memref<1x4x16x16xf32, #tpu.memory_space<vmem>>, vector<1x4x16x16xf32>
    tpu.vector_store %arg12[%c0_68, %c0_69, %c0_70, %c0_71], %130 {strides = array<i32>} : memref<1x4x16x16xf32, #tpu.memory_space<vmem>>, vector<1x4x16x16xf32>,
    return
  }
  func.func @transform_0(%arg0: i32, %arg1: i32) -> (i32, i32, i32, i32) {
    %c0_i32 = arith.constant 0 : i32
    %c0_i32_0 = arith.constant 0 : i32
    %c0_i32_1 = arith.constant 0 : i32
    %c0_i32_2 = arith.constant 0 : i32
    return %arg0, %c0_i32, %c0_i32_0, %c0_i32_1 : i32, i32, i32, i32
  }
  func.func @transform_1(%arg0: i32, %arg1: i32) -> (i32, i32) {
    %c0_i32 = arith.constant 0 : i32
    %c0_i32_0 = arith.constant 0 : i32
    %c0_i32_1 = arith.constant 0 : i32
    return %c0_i32, %c0_i32_0 : i32, i32
  }
  func.func @transform_2(%arg0: i32, %arg1: i32) -> (i32, i32) {
    %c0_i32 = arith.constant 0 : i32
    %c0_i32_0 = arith.constant 0 : i32
    %c0_i32_1 = arith.constant 0 : i32
    return %c0_i32, %c0_i32_0 : i32, i32
  }
  func.func @transform_3(%arg0: i32, %arg1: i32) -> (i32, i32) {
    %c0_i32 = arith.constant 0 : i32
    %c0_i32_0 = arith.constant 0 : i32
    %c0_i32_1 = arith.constant 0 : i32
    return %c0_i32, %c0_i32_0 : i32, i32
  }
  func.func @transform_4(%arg0: i32, %arg1: i32) -> (i32, i32, i32) {
    %c0_i32 = arith.constant 0 : i32
    %c0_i32_0 = arith.constant 0 : i32
    %c0_i32_1 = arith.constant 0 : i32
    %c0_i32_2 = arith.constant 0 : i32
    return %c0_i32, %c0_i32_0, %c0_i32_1 : i32, i32, i32
  }
  func.func @transform_5(%arg0: i32, %arg1: i32) -> (i32, i32) {
    %c0_i32 = arith.constant 0 : i32
    %c0_i32_0 = arith.constant 0 : i32
    %c0_i32_1 = arith.constant 0 : i32
    return %c0_i32, %c0_i32_0 : i32, i32
  }
  func.func @transform_6(%arg0: i32, %arg1: i32) -> (i32, i32) {
    %c0_i32 = arith.constant 0 : i32
    %c0_i32_0 = arith.constant 0 : i32
    %c0_i32_1 = arith.constant 0 : i32
    return %c0_i32, %c0_i32_0 : i32, i32
  }
  func.func @transform_7(%arg0: i32, %arg1: i32) -> (i32, i32) {
    %c0_i32 = arith.constant 0 : i32
    %c0_i32_0 = arith.constant 0 : i32
    %c0_i32_1 = arith.constant 0 : i32
    return %c0_i32, %c0_i32_0 : i32, i32
  }
  func.func @transform_8(%arg0: i32, %arg1: i32) -> (i32, i32) {
    %c0_i32 = arith.constant 0 : i32
    %c0_i32_0 = arith.constant 0 : i32
    %c0_i32_1 = arith.constant 0 : i32
    return %c0_i32, %c0_i32_0 : i32, i32
  }
  func.func @transform_9(%arg0: i32, %arg1: i32) -> (i32, i32) {
    %c0_i32 = arith.constant 0 : i32
    %c0_i32_0 = arith.constant 0 : i32
    %c0_i32_1 = arith.constant 0 : i32
    return %c0_i32, %c0_i32_0 : i32, i32
  }
  func.func @transform_10(%arg0: i32, %arg1: i32) -> (i32, i32, i32, i32) {
    %c0_i32 = arith.constant 0 : i32
    %c0_i32_0 = arith.constant 0 : i32
    %c0_i32_1 = arith.constant 0 : i32
    return %arg0, %arg1, %c0_i32, %c0_i32_0 : i32, i32, i32, i32
  }
}

</mosaic_0001>

<bundles_post_ra>
// kernel: tpu_custom_call.1
= control target key start
LH: loop header
LB: loop body
LE: loop exit
PB: predicated region body
PF: predicated region fallthrough
CT: control target
= control target key end

     0   :  { %s2486_s0 = inlined_call_operand.hbm [shape: f32[2,16,16,16], index: 0, kind: input, shape index: {}]   ;;  %s2487_s1 = inlined_call_operand.vmem [shape: bf16[16,4], index: 1, kind: input, shape index: {}]   ;;  %s2488_s2 = inlined_call_operand.vmem [shape: f32[1,4], index: 2, kind: input, shape index: {}]   ;;  %s2489_s3 = inlined_call_operand.vmem [shape: f32[1,4], index: 3, kind: input, shape index: {}]   ;;  %s2490_s4 = inlined_call_operand.vmem [shape: bf16[3,4,12], index: 4, kind: input, shape index: {}]   ;;  %s2491_s5 = inlined_call_operand.vmem [shape: f32[1,4], index: 5, kind: input, shape index: {}]   ;;  %s2492_s6 = inlined_call_operand.vmem [shape: f32[1,4], index: 6, kind: input, shape index: {}]   ;;  %s2493_s7 = inlined_call_operand.vmem [shape: bf16[4,16], index: 7, kind: input, shape index: {}]   ;;  %s2494_s8 = inlined_call_operand.vmem [shape: f32[1,16], index: 8, kind: input, shape index: {}]   ;;  %s2495_s9 = inlined_call_operand.vmem [shape: f32[1,16], index: 9, kind: input, shape index: {}]   ;;  %s2496_s10 = inlined_call_operand.hbm [shape: f32[2,16,16,16], index: 10, kind: output, shape index: {}]  }
   0x1   :  { %2504 = sst [smem:[#allocation14_spill]] %s2493_s7 }
   0x2   :  { %2505 = sst [smem:[#allocation15_spill]] %s2494_s8 }
   0x3   :  { %2506 = sst [smem:[#allocation16_spill]] %s2495_s9 }
   0x4   :  { %2507 = sst [smem:[#allocation17_spill]] %s2496_s10 }
   0x5   :  { %15 = vsyncpa [#allocation3], 0 }
   0x6   :  { %17 = vsyncpa [#allocation3 + $0x1], 0 }
   0x7   :  { %18 = vsyncpa [#allocation4], 0 }
   0x8   :  { %20 = vsyncpa [#allocation4 + $0x1], 0  ;;  %s2001_s13 = smov 0   ;;  %s2003_s14 = smov 0  }
   0x9   :  { %s2005_s15 = smov 0   ;;  %s2007_s16 = smov 0  }
   0xa   :  { %s2009_s17 = smov 0   ;;  %s2011_s18 = smov 0  }
   0xb   :  { %s2013_s19 = smov 0   ;;  %s2015_s20 = smov 0  }
   0xc   :  { %s2017_s21 = smov 0   ;;  %s2019_s22 = smov 0  }
   0xd   :  { %s2021_s23 = smov 0  }
   0xe LB: > { %2508 = sst [smem:[#allocation8_spill]] %s1921_s20  ;;  %s1522_s24 = sadd.s32 4294967295, %s1933_s23   ;;  %s1933_s23 = sphi %s2021_s23, %s26_s23   ;;  %s1929_s22 = sphi %s2019_s22, %s2541_s22   ;;  %s1925_s21 = sphi %s2017_s21, %s2540_s21   ;;  %s1921_s20 = sphi %s2015_s20, %s2539_s20   ;;  %s1917_s19 = sphi %s2013_s19, %s2529_s19   ;;  %s1913_s18 = sphi %s2011_s18, %s2538_s18   ;;  %s1909_s17 = sphi %s2009_s17, %s2537_s17   ;;  %s1905_s16 = sphi %s2007_s16, %s2536_s16   ;;  %s1901_s15 = sphi %s2005_s15, %s2535_s15   ;;  %s1897_s14 = sphi %s2003_s14, %s2534_s14   ;;  %s1893_s13 = sphi %s2001_s13, %s2533_s13  }
   0xf   : > { %2509 = sst [smem:[#allocation9_spill]] %s1925_s21  ;;  %s1523_s25 = sadd.s32 4294967294, %s1933_s23  }
  0x10   : > { %2510 = sst [smem:[#allocation10_spill]] %s1929_s22  ;;  %s35_s26 = sadd.s32 1, %s1925_s21 }
  0x11   : > { %s38_s27 = sadd.s32 1, %s1929_s22  ;;  %p36_p0 = scmp.ge.s32.totalorder %s35_s26, 4 }
  0x12   : > { %s45_s28 = sadd.s32 1, %s1913_s18  ;;  %p52_p1 = scmp.ne.s32.totalorder %s1913_s18, %s1909_s17 }
  0x13   : > { %p53_p2 = scmp.eq.s32.totalorder %s1933_s23, 0  ;;  %s2543_s26 = smov (%p36_p0, %s35_s26), 0 }
  0x14   : > { %2511 = sst [smem:[#allocation11_spill]] %s2543_s26  ;;  %s2545_s27 = smov (!%p36_p0, %s38_s27), %s1929_s22 }
  0x15   : > { %p2065_p3 = por %p53_p2, %p52_p1  ;;  %p58_p4 = scmp.ne.s32.totalorder %s1909_s17, %s1905_s16 }
  0x16   : > { %p40_p5 = scmp.ge.s32.totalorder %s2545_s27, 2  ;;  %p59_p6 = scmp.eq.s32.totalorder %s1522_s24, 0 }
  0x17   : > { %s258_s30 = ssub.s32 %s1925_s21, %s2543_s26  ;;  %s262_s11 = sadd.s32 1, %s1901_s15 }
  0x18   : > { %s2547_s27 = smov (%p40_p5, %s2545_s27), 0  ;;  %p2075_p7 = por %p59_p6, %p58_p4 }
  0x19   : > { %2513 = sst [smem:[#allocation12_spill]] %s2547_s27  ;;  %p272_p8 = scmp.ne.s32.totalorder %s1901_s15, %s1897_s14 }
  0x1a   : > { %s42_s10 = ssub.s32 %s1929_s22, %s2547_s27  ;;  %p273_p9 = scmp.eq.s32.totalorder %s1522_s24, 7 }
  0x1b   : > { %p43_p10 = scmp.eq.s32.totalorder %s42_s10, 0  ;;  %s259_s16 = sor.u32 %s258_s30, %s42_s10 }
  0x1c   : > { %p260_p11 = scmp.eq.s32.totalorder %s259_s16, 0  ;;  %p2083_p12 = por %p273_p9, %p272_p8 }
  0x1d   : > { %s2088_s21 = scalar_select %p43_p10, %s1913_s18, %s45_s28  }
  0x1e   : > { %s2515_s26 = scalar_select %p2083_p12, 1, 0 }
  0x1f   : > { %s2091_s20 = scalar_select %p260_p11, %s1901_s15, %s262_s11  }
  0x20   : > { %2516 = sst [smem:[#allocation13_spill]] %s2515_s26  ;;  %p278_p13 = scmp.ne.s32.totalorder %s1897_s14, %s1893_s13 }
  0x21   : > { %p279_p0 = scmp.eq.s32.totalorder %s1523_s25, 7  ;;  %p1685_p1 = scmp.lt.s32.totalorder %s1933_s23, 8 }
  0x22   : > { %s326_s24 = sand.u32 1, %s1913_s18   ;;  %s1575_s30 = sshll.u32 %s1929_s22, 12 }
  0x23   : > { %p2096_p2 = por %p279_p0, %p278_p13  ;;  %s1526_s10 = sshll.u32 %s326_s24, 8 }
  0x24   : > { %s336_s8 = scalar_lea.hbm %s2486_s0, %s1575_s30  ;;  %s330_s7 = scalar_lea.vmem [#allocation2], %s1526_s10 }
  0x25   : > { %s337_s26 = sshll.u32 %s330_s7, 4  ;;  %p2107_p4 = pnand %p1685_p1, %p2065_p3  ;;  %s338_s26 = int_to_ptr.vmem [resolvable:$true] %s337_s26 }
  0x26   : > { %p1529_p5 = scmp.ge.s32.totalorder %s1933_s23, 1  ;;  %s327_s25 = scalar_lea.sflag [#allocation3], %s326_s24 }
  0x27   : > { %p1787_p6 = pneg %p2107_p4  ;;  %s1798_s11 = scalar_lea.vmem %s338_s26, 4096 }
  0x28   : > { %p1799_p8 = scmp.ne.s32.totalorder %s338_s26, %s1798_s11  ;;  %s1935_s22 = smov [#allocation2]  }
  0x29   : > { %s1803_s27 = sshll.u32 %s1935_s22, 4  ;;  %s1804_s27 = int_to_ptr.vmem [resolvable:$false] %s1803_s27 }
  0x2a   : > { %p1801_p9 = pnand %p1799_p8, %p1787_p6  ;;  %s1805_s10 = scalar_lea.vmem %s1804_s27, 8192 }
  0x2b   : > { %p1806_p11 = scmp.lt.s32.totalorder %s338_s26, %s1804_s27  ;;  %p1807_p13 = scmp.lt.s32.totalorder %s1805_s10, %s1798_s11 }
  0x2c   : > { %p1802_p10 = pneg %p1801_p9 }
  0x2d   : > { %p1808_p0 = por %p1807_p13, %p1806_p11 }
  0x2f   : > { %p1809_p3 = pnand %p1808_p0, %p1802_p10 }
  0x31   : > { %1812 = shalt.err (!%p1809_p3)
}
  0x32   : > { %s1936_s7 = smov 128   ;;  %s1937_s29 = smov 8  }
  0x33   : > { %1680 = dma.hbm_to_vmem [thread:$0]  (!%p2107_p4), %s336_s8, 4096, %s338_s26, %s327_s25, %s1936_s7, %s1936_s7, %s1937_s29  }
  0x34   : > { %p345_p1 = scmp.lt.s32.totalorder %s1933_s23, 9 }
  0x36   : > { %p346_p6 = pnand %p1529_p5, %p345_p1 }
  0x37   : > { %s351_s22 = sand.u32 (!%p346_p6), 1, %s1909_s17  }
  0x38   : > { %349 = sbr.rel (%p346_p6) target bundleno = 1089 (0x441), region = 60  ;;  %s1530_s24 = sshll.u32 (!%p346_p6), %s351_s22, 8 }
  0x39   : > { %s352_s30 = scalar_lea.sflag (!%p346_p6), [#allocation3], %s351_s22  ;;  %s2120_s16 = scalar_lea.vmem (!%p346_p6), [#allocation2], %s1530_s24 }
  0x3d   : > { %1884 = dma.done.wait (%p2075_p7), %s352_s30, 4096  }
  0x3e   : > { %1886 = vsyncadd (%p2075_p7), %s352_s30, 4294963200  ;;  %s1576_s8 = sshll.u32 %s1917_s19, 6  ;;  %s1532_s26 = sshll.u32 %s1917_s19, 2  ;;  %v1938_v0 = vmov 0.0   ;;  %vm1939_vm0 = vmmov 0   ;;  %v1784_v1 = vld [vmem:[%s2487_s1] sm:$0xff]  }
  0x3f   : > { %1607 = vmatprep.subr.bf16.mxu0 %v1938_v0  ;;  %1609 = vmatprep.mubr.msk.bf16.mxu0 %vm1939_vm0, %v1938_v0  ;;  %s1533_s28 = sadd.s32 4294967295, %s1532_s26  ;;  %s412_s25 = sadd.s32 4, %s1532_s26  ;;  %vm429_vm1 = vcmask 130048   ;;  %vm683_vm2 = vcmask 1041408   ;;  %v1546_v20 = vld [vmem:[%s2490_s4 + $0x2] sm:$0x3] }
  0x40   : > { %p396_p4 = scmp.gt.s32.totalorder %s1533_s28, 0  ;;  %s2130_s11 = scalar_lea.vmem %s2120_s16, %s1576_s8 [#allocation2]  ;;  %1613 = vmatprep.subr.bf16.mxu1 %v1784_v1  ;;  %1608 = vmatpush3.bf16.msra.mxu0 %v1784_v1  ;;  %v667_v21 = vld [vmem:[%s2490_s4] sm:$0x3]  ;;  %v685_v22 = vsel %vm683_vm2, %v1546_v20, 0  ;;  %v1555_v24 = vld [vmem:[%s2490_s4 + $0x4] sm:$0x3] }
  0x41   : > { %p413_p7 = scmp.lt.s32.totalorder %s412_s25, 15  ;;  %v2137_v2 = vld [vmem:[%s2130_s11] sm:$0xff]  ;;  %v2140_v3 = vld [vmem:[%s2130_s11 + $0x8] sm:$0xff]  ;;  %v2145_v7 = vld [vmem:[%s2130_s11 + $0x10] sm:$0xff]  ;;  %1614 = vmatpush3.bf16.msra.mxu1 %v1784_v1  ;;  %1623 = vmatprep.subr.bf16.mxu0 %v1938_v0  ;;  %v756_v23 = vsel %vm683_vm2, %v667_v21, 0  ;;  %p419_p5 = scmp.gt.s32.totalorder %s1917_s19, 0 }
  0x42   : > { %s2549_s28 = smov (!%p396_p4, %s1533_s28), 0  ;;  %v500_v5 = vpack.c.bf16 %v2140_v3, %v2137_v2  ;;  %v2148_v8 = vld [vmem:[%s2130_s11 + $0x18] sm:$0xff]  ;;  %v2153_v11 = vld [vmem:[%s2130_s11 + $0x20] sm:$0xff]  ;;  %v2156_v12 = vld [vmem:[%s2130_s11 + $0x28] sm:$0xff]  ;;  %1670 = vmatprep.subr.msk.bf16.mxu1 %vm683_vm2, %v667_v21  ;;  %vm670_vm4 = vcmask 31744   ;;  %p609_p8 = scmp.lt.s32.totalorder %s1917_s19, 3 }
  0x43   : > { %s2551_s25 = smov (!%p413_p7, %s412_s25), 15  ;;  %s1534_s12 = sshll.u32 %s2549_s28, 4  ;;  %v501_v10 = vpack.c.bf16 %v2148_v8, %v2145_v7  ;;  %v502_v13 = vpack.c.bf16 %v2156_v12, %v2153_v11  ;;  %v2166_v16 = vld [vmem:[%s2130_s11 + $0x30] sm:$0xff]  ;;  %v2169_v17 = vld [vmem:[%s2130_s11 + $0x38] sm:$0xff]  ;;  %v2194_v26 = vld [vmem:[%s2488_s2] ss:$0 sm:$0xff] }
  0x44   : > { %s399_s7 = scalar_lea.vmem %s2120_s16, %s1534_s12 [#allocation2]  ;;  %s1536_s29 = sshll.u32 %s2551_s25, 4  ;;  %1615 = vmatprep.mubr.msk.bf16.mxu1 %vm429_vm1, %v500_v5  ;;  %v503_v19 = vpack.c.bf16 %v2169_v17, %v2166_v16  ;;  %v2200_v29 = vld [vmem:[%s2489_s3] ss:$0 sm:$0xff] }
  0x45   : > { %v400_v4 = vld [vmem:[%s399_s7] sm:$0xff]  ;;  %v401_v6 = vld [vmem:[%s399_s7 + $0x8] sm:$0xff]  ;;  %s416_s22 = scalar_lea.vmem %s2120_s16, %s1536_s29 [#allocation2]  ;;  %1616 = vmatmul.mubr.msk.bf16.vlgmr.msra.gmra.mxu1 %vm429_vm1, %v501_v10  ;;  %v829_v10 = vsel %vm683_vm2, %v1555_v24, 0  ;;  %s1940_s29 = smov 120  }
  0x46   : > { %v420_v9 = vpack.c.bf16 %v401_v6, %v400_v4  ;;  %v417_v14 = vld [vmem:[%s416_s22] sm:$0xff]  ;;  %v418_v15 = vld [vmem:[%s416_s22 + $0x8] sm:$0xff]  ;;  %1619 = vmatprep.mubr.msk.bf16.mxu1 %vm429_vm1, %v502_v13  ;;  %1640 = vmatpush3.bf16.msra.mxu1 %v756_v23  ;;  %s494_s25 = scalar_select %p419_p5, 1, 0 }
  0x47   : > { %v610_v18 = vpack.c.bf16 %v418_v15, %v417_v14  ;;  %s661_s7 = scalar_select %p609_p8, 1, 0 }
  0x48   : > { %1610 = vmatmul.mubr.msk.bf16.vlgmr.msra.gmra.mxu0 %vm429_vm1, %v420_v9  ;;  %v495_v32 = vstv %s494_s25  ;;  %s1941_s22 = smov 4   ;;  %s2523_s25 = sld [smem:[#allocation14_spill]] }
  0x49   : > { %1624 = vmatpush3.bf16.msra.mxu0 %v1784_v1  ;;  %1625 = vmatprep.mubr.msk.bf16.mxu0 %vm1939_vm0, %v1938_v0  ;;  %vm496_vm3 = vcmp.eq.s32.totalorder %v495_v32, 1  ;;  %v662_v32 = vstv %s661_s7  ;;  %s1942_s11 = smov 124   ;;  %s2524_s10 = sld [smem:[#allocation15_spill]] }
  0x4a   : > { %1669 = vmatprep.subr.msk.bf16.mxu0 %vm683_vm2, %v1546_v20  ;;  %vm663_vm5 = vcmp.eq.s32.totalorder %v662_v32, 1  ;;  %s389_s7 = sand.u32 1, %s1897_s14   ;;  %s2525_s24 = sld [smem:[#allocation16_spill]] }
  0x4b   : > { %s1531_s30 = sshll.u32 %s389_s7, 6  ;;  %s2526_s8 = sld [smem:[#allocation8_spill]] }
  0x4c   : > { %s2390_s16 = scalar_lea.vmem [#allocation5], %s1531_s30  ;;  %s1577_s26 = sshll.u32 %s1917_s19, 3 }
  0x4d   : > { %1620 = vmatmul.mubr.msk.bf16.gmra.mxu1 %vm429_vm1, %v503_v19  ;;  %s1429_s12 = sshll.u32 %s2390_s16, 4  ;;  %s2418_s12 = int_to_ptr.vmem [resolvable:$true] %s1429_s12 }
  0x4e   : > { %s1813_s30 = scalar_lea.vmem %s2418_s12, 1024 }
  0x4f   : > { %p1814_p9 = scmp.ne.s32.totalorder %s2418_s12, %s1813_s30 }
  0x50   : > { %1626 = vmatmul.mubr.msk.bf16.vlgmr.msra.gmra.mxu0 %vm429_vm1, %v610_v18 }
  0x51   : > { %1630 = vmatpush3.bf16.msra.mxu0 %v685_v22  ;;  %s1571_s28 = sshll.u32 %s2526_s8, 5  ;;  %p1815_p10 = pnand %p1814_p9, %p2083_p12 }
  0x52   : > { %1671 = vmatprep.subr.msk.bf16.mxu0 %vm683_vm2, %v1555_v24  ;;  %s1943_s8 = smov [#allocation5]  }
  0x53   : > { %p1816_p11 = pneg %p1815_p10 }
 0x105   : > { %v1617_v28 = vpop.f32.mrf.mxu1 }
 0x106   : > { %v583_v37 = vmul.f32 %v1617_v28, %v2194_v26 }
 0x107   : > { %v550_v33 = vpop.f32.mrf.mxu1 }
 0x108   : > { %v467_v25 = vpop.f32.mrf.mxu0  ;;  %v581_v34 = vmul.f32 %v2194_v26, %v550_v33  ;;  %v591_v49 = vadd.f32 %v2200_v29, %v583_v37 }
 0x109   : > { %v481_v27 = vmul.f32 %v2194_v26, %v467_v25  ;;  %v1618_v39 = vpop.f32.mrf.mxu1 }
 0x10a   : > { %v1611_v30 = vpop.f32.mrf.mxu0  ;;  %v584_v40 = vmul.f32 %v1618_v39, %v2194_v26  ;;  %v589_v44 = vadd.f32 %v2200_v29, %v581_v34  ;;  %v599_v61 = vmax.f32 %v591_v49, 0.0 }
 0x10b   : > { %v490_v31 = vadd.f32 %v2200_v29, %v481_v27  ;;  %v553_v43 = vpop.f32.mrf.mxu1 }
 0x10c   : > { %v470_v35 = vpop.f32.mrf.mxu0  ;;  %v592_v45 = vadd.f32 %v2200_v29, %v584_v40  ;;  %v582_v46 = vmul.f32 %v2194_v26, %v553_v43  ;;  %v597_v57 = vmax.f32 %v589_v44, 0.0 }
 0x10d   : > { %v492_v36 = vmax.f32 %v490_v31, 0.0  ;;  %v482_v38 = vmul.f32 %v2194_v26, %v470_v35  ;;  %v1621_v51 = vpop.f32.mrf.mxu1 }
 0x10e   : > { %v1612_v41 = vpop.f32.mrf.mxu0  ;;  %v590_v52 = vadd.f32 %v2200_v29, %v582_v46  ;;  %v600_v55 = vmax.f32 %v592_v45, 0.0  ;;  %v587_v62 = vmul.f32 %v1621_v51, %v2194_v26  ;;  %v904_v51 = vlaneseq }
 0x10f   : > { %v491_v42 = vadd.f32 %v2200_v29, %v482_v38  ;;  %v497_v48 = vsel %vm496_vm3, %v492_v36, 0.0  ;;  %v566_v56 = vpop.f32.mrf.mxu1 }
 0x110   : > { %v648_v47 = vpop.f32.mrf.mxu0  ;;  %v598_v59 = vmax.f32 %v590_v52, 0.0  ;;  %v585_v63 = vmul.f32 %v2194_v26, %v566_v56  ;;  %v606_v6 = vpack.c.bf16 %v600_v55, %v599_v61  ;;  %v595_v18 = vadd.f32 %v2200_v29, %v587_v62 }
 0x111   : > { %v493_v50 = vmax.f32 %v491_v42, 0.0  ;;  %v1622_v0 = vpop.f32.mrf.mxu1  ;;  %v655_v25 = vmul.f32 %v2194_v26, %v648_v47 }
 0x112   : > { %v1627_v53 = vpop.f32.mrf.mxu0  ;;  %v605_v1 = vpack.c.bf16 %v598_v59, %v597_v57  ;;  %v588_v4 = vmul.f32 %v1622_v0, %v2194_v26  ;;  %v593_v13 = vadd.f32 %v2200_v29, %v585_v63  ;;  %v603_v23 = vmax.f32 %v595_v18, 0.0 }
 0x113   : > { %v498_v54 = vsel %vm496_vm3, %v493_v50, 0.0  ;;  %v569_v9 = vpop.f32.mrf.mxu1  ;;  %v657_v30 = vadd.f32 %v2200_v29, %v655_v25 }
 0x114   : > { %v499_v58 = vpack.c.bf16 %v498_v54, %v497_v48  ;;  %v651_v60 = vpop.f32.mrf.mxu0  ;;  %v596_v14 = vadd.f32 %v2200_v29, %v588_v4  ;;  %v586_v15 = vmul.f32 %v2194_v26, %v569_v9  ;;  %1631 = vmatprep.mubr.msk.bf16.mxu0 %vm670_vm4, %v605_v1  ;;  %v601_v21 = vmax.f32 %v593_v13, 0.0 }
 0x115   : > { %1632 = vmatmul.mubr.msk.bf16.vlgmr.msra.gmra.mxu0 %vm670_vm4, %v606_v6  ;;  %v656_v27 = vmul.f32 %v2194_v26, %v651_v60  ;;  %v659_v33 = vmax.f32 %v657_v30, 0.0 }
 0x116   : > { %1641 = vmatprep.mubr.msk.bf16.mxu1 %vm670_vm4, %v499_v58  ;;  %v1628_v5 = vpop.f32.mrf.mxu0  ;;  %v594_v19 = vadd.f32 %v2200_v29, %v586_v15  ;;  %1650 = vmatpush3.bf16.msra.mxu0 %v829_v10  ;;  %v604_v20 = vmax.f32 %v596_v14, 0.0  ;;  %v2245_v58 = vshrl.u32 %v904_v51, 7 }
 0x117   : > { %1642 = vmatmul.mubr.msk.bf16.vlgmr.msra.gmra.mxu1 %vm670_vm4, %v605_v1  ;;  %v658_v31 = vadd.f32 %v2200_v29, %v656_v27  ;;  %v664_v26 = vsel %vm663_vm5, %v659_v33, 0.0 }
 0x118   : > { %1645 = vmatprep.mubr.msk.bf16.mxu1 %vm670_vm4, %v606_v6  ;;  %v602_v22 = vmax.f32 %v594_v19, 0.0  ;;  %v608_v28 = vpack.c.bf16 %v604_v20, %v603_v23  ;;  %v907_v4 = vadd.s32 16, %v2245_v58  ;;  %vm1025_vm7 = vcmp.lt.s32.totalorder %v2245_v58, 1 }
 0x119   : > { %v660_v34 = vmax.f32 %v658_v31, 0.0  ;;  %vm1146_vm10 = vcmp.lt.s32.totalorder %v2245_v58, 7 }
 0x11a   : > { %v607_v24 = vpack.c.bf16 %v602_v22, %v601_v21  ;;  %v931_v15 = vand.u32 15, %v907_v4  ;;  %v910_v4 = vadd.s32 40, %v2245_v58 }
 0x11b   : > { %v665_v35 = vsel %vm663_vm5, %v660_v34, 0.0 }
 0x11c   : > { %1635 = vmatprep.mubr.msk.bf16.mxu0 %vm670_vm4, %v607_v24  ;;  %v666_v36 = vpack.c.bf16 %v665_v35, %v664_v26  ;;  %vm1011_vm6 = vcmp.ne.s32.totalorder %v931_v15, 0 }
 0x11d   : > { %1636 = vmatmul.mubr.msk.bf16.gmra.mxu0 %vm670_vm4, %v608_v28 }
 0x11e   : > { %1651 = vmatprep.mubr.msk.bf16.mxu0 %vm670_vm4, %v606_v6 }
 0x11f   : > { %1646 = vmatmul.mubr.msk.bf16.gmra.mxu1 %vm670_vm4, %v607_v24 }
 0x125   : > { %1652 = vmatmul.mubr.msk.bf16.vlgmr.msra.gmra.mxu0 %vm670_vm4, %v607_v24  ;;  %v909_v24 = vadd.s32 32, %v2245_v58 }
 0x126   : > { %1655 = vmatprep.mubr.msk.bf16.mxu0 %vm670_vm4, %v608_v28 }
 0x127   : > { %v945_v26 = vand.u32 15, %v909_v24 }
 0x129   : > { %vm1013_vm8 = vcmp.ne.s32.totalorder %v945_v26, 0 }
 0x12d   : > { %1656 = vmatmul.mubr.msk.bf16.gmra.mxu0 %vm670_vm4, %v666_v36  ;;  %v1560_v36 = vld [vmem:[%s2491_s5] ss:$0 sm:$0xff] }
 0x1d5   : > { %v1633_v38 = vpop.f32.mrf.mxu0 }
 0x1d7   : > { %v1643_v37 = vpop.f32.mrf.mxu1  ;;  %v721_v40 = vpop.f32.mrf.mxu0 }
 0x1d8   : > { %v801_v49 = vadd.f32 %v1643_v37, %v1633_v38 }
 0x1d9   : > { %v792_v39 = vpop.f32.mrf.mxu1  ;;  %v1634_v41 = vpop.f32.mrf.mxu0 }
 0x1da   : > { %v793_v52 = vadd.f32 %v792_v39, %v721_v40 }
 0x1db   : > { %v1644_v42 = vpop.f32.mrf.mxu1  ;;  %v724_v29 = vpop.f32.mrf.mxu0 }
 0x1dc   : > { %v804_v59 = vadd.f32 %v1644_v42, %v1634_v41  ;;  %v917_v41 = vand.u32 15, %v2245_v58 }
 0x1dd   : > { %v1637_v43 = vpop.f32.mrf.mxu0  ;;  %v795_v44 = vpop.f32.mrf.mxu1 }
 0x1de   : > { %v796_v60 = vadd.f32 %v795_v44, %v724_v29  ;;  %vm1009_vm9 = vcmp.ne.s32.totalorder %v917_v41, 0  ;;  %v1561_v44 = vld [vmem:[%s2492_s6] ss:$0 sm:$0xff] }
 0x1df   : > { %v737_v45 = vpop.f32.mrf.mxu0  ;;  %v1647_v47 = vpop.f32.mrf.mxu1 }
 0x1e0   : > { %v817_v10 = vadd.f32 %v1647_v47, %v1637_v43 }
 0x1e1   : > { %v1638_v46 = vpop.f32.mrf.mxu0  ;;  %v808_v54 = vpop.f32.mrf.mxu1 }
 0x1e2   : > { %v809_v5 = vadd.f32 %v808_v54, %v737_v45 }
 0x1e3   : > { %v740_v48 = vpop.f32.mrf.mxu0  ;;  %v1648_v61 = vpop.f32.mrf.mxu1 }
 0x1e4   : > { %v820_v25 = vadd.f32 %v1648_v61, %v1638_v46 }
 0x1e5   : > { %v1653_v50 = vpop.f32.mrf.mxu0  ;;  %v811_v6 = vpop.f32.mrf.mxu1 }
 0x1e6   : > { %v2239_v53 = vadd.f32 %v1653_v50, %v801_v49  ;;  %v812_v18 = vadd.f32 %v811_v6, %v740_v48  ;;  %v906_v48 = vadd.s32 8, %v2245_v58 }
 0x1e7   : > { %v865_v55 = vpop.f32.mrf.mxu0 }
 0x1e8   : > { %v2241_v56 = vadd.f32 %v865_v55, %v793_v52  ;;  %1118 = vrot.lane.b32.xlu0 %v2239_v53, %s1940_s29  ;;  %v1019_v22 = vrot.slane %v2239_v53, 7  ;;  %v924_v51 = vand.u32 15, %v906_v48  ;;  %v908_v52 = vadd.s32 24, %v2245_v58 }
 0x1e9   : > { %v1654_v57 = vpop.f32.mrf.mxu0 }
 0x1ea   : > { %1114 = vrot.lane.b32.xlu1 %v2241_v56, %s1940_s29  ;;  %v2249_v63 = vadd.f32 %v1654_v57, %v804_v59  ;;  %v1017_v35 = vrot.slane %v2241_v56, 7  ;;  %vm2321_vm11 = vcmp.ne.s32.totalorder %v924_v51, 15  ;;  %v938_v59 = vand.u32 15, %v908_v52 }
 0x1eb   : > { %v868_v62 = vpop.f32.mrf.mxu0 }
 0x1ec   : > { %v2251_v0 = vadd.f32 %v868_v62, %v796_v60  ;;  %v1020_v37 = vrot.slane %v2249_v63, 7  ;;  %v911_v60 = vadd.s32 48, %v2245_v58  ;;  %vm2334_vm12 = vcmp.ne.s32.totalorder %v938_v59, 15 }
 0x1ed   : > { %v1657_v1 = vpop.f32.mrf.mxu0 }
 0x1ee   : > { %1120 = vrot.lane.b32.xlu1 %v2249_v63, %s1940_s29  ;;  %1116 = vrot.lane.b32.xlu0 %v2251_v0, %s1940_s29  ;;  %v1018_v19 = vrot.slane %v2251_v0, 7  ;;  %v2261_v20 = vadd.f32 %v1657_v1, %v817_v10  ;;  %v1030_v29 = vsel %vm1025_vm7, %v1019_v22, %v1020_v37  ;;  %v959_v15 = vand.u32 15, %v911_v60 }
 0x1ef   : > { %v881_v9 = vpop.f32.mrf.mxu0 }
 0x1f0   : > { %v2258_v13 = vadd.f32 %v881_v9, %v809_v5  ;;  %v1023_v27 = vrot.slane %v2261_v20, 7  ;;  %v1031_v30 = vsel %vm1025_vm7, %v1018_v19, %v1019_v22  ;;  %v1032_v38 = vsel %vm1025_vm7, %v1017_v35, %v1018_v19 }
 0x1f1   : > { %v1658_v14 = vpop.f32.mrf.mxu0  ;;  %v1052_v33 = vsel %vm1011_vm6, %v1031_v30, 0.0  ;;  %v912_v22 = vadd.s32 56, %v2245_v58  ;;  %vm1015_vm13 = vcmp.ne.s32.totalorder %v959_v15, 0 }
 0x1f2   : > { %1122 = vrot.lane.b32.xlu0 %v2258_v13, %s1940_s29  ;;  %v2278_v31 = vadd.f32 %v1658_v14, %v820_v25  ;;  %v1021_v34 = vrot.slane %v2258_v13, 7 }
 0x1f3   : > { %v884_v21 = vpop.f32.mrf.mxu0  ;;  %v966_v26 = vand.u32 15, %v912_v22 }
 0x1f4   : > { %v2266_v23 = vadd.f32 %v884_v21, %v812_v18  ;;  %v1024_v39 = vrot.slane %v2278_v31, 7  ;;  %v1029_v40 = vsel %vm1025_vm7, %v1020_v37, %v1021_v34  ;;  %v952_v21 = vand.u32 15, %v910_v4 }
 0x1f5   : > { %v1054_v42 = vsel %vm1013_vm8, %v1029_v40, 0.0  ;;  %vm1105_vm15 = vcmp.ne.s32.totalorder %v966_v26, 15 }
 0x1f6   : > { %v1022_v28 = vrot.slane %v2266_v23, 7  ;;  %1126 = vrot.lane.b32.xlu0 %v2261_v20, %s1940_s29  ;;  %1124 = vrot.lane.b32.xlu1 %v2266_v23, %s1940_s29  ;;  %v1033_v43 = vsel %vm1025_vm7, %v1024_v39, %v1017_v35  ;;  %v1026_v47 = vsel %vm1025_vm7, %v1023_v27, %v1024_v39  ;;  %vm1103_vm14 = vcmp.ne.s32.totalorder %v952_v21, 15 }
 0x1f7   : > { %v1050_v45 = vsel %vm1009_vm9, %v1033_v43, 0.0 }
 0x1f8   : > { %v2282_v32 = vsel %vm1025_vm7, %v1022_v28, %v1023_v27  ;;  %v1028_v46 = vsel %vm1025_vm7, %v1021_v34, %v1022_v28 }
 0x1f9   : > { %v1056_v35 = vsel %vm1015_vm13, %v2282_v32, 0.0 }
 0x1fa   : > { %1070 = vrot.lane.b32.xlu0 %v1052_v33, %s1941_s22  ;;  %1128 = vrot.lane.b32.xlu1 %v2278_v31, %s1940_s29  ;;  %s2528_s29 = sld [smem:[#allocation17_spill]] }
 0x1fe   : > { %1225 = vrot.lane.b32.xlu0 %v1560_v36, %s1941_s22  ;;  %1068 = vrot.lane.b32.xlu1 %v1032_v38, %s1941_s22 }
 0x202   : > { %1074 = vrot.lane.b32.xlu0 %v1054_v42, %s1941_s22  ;;  %1072 = vrot.lane.b32.xlu1 %v1030_v29, %s1941_s22  ;;  %v1265_v42 = vld [vmem:[%s2523_s25] sm:$0x3]  ;;  %s1426_s25 = sadd.s32 %s1577_s26, %s1571_s28  ;;  %s1817_s26 = sshll.u32 %s1943_s8, 4  ;;  %s1818_s26 = int_to_ptr.vmem [resolvable:$false] %s1817_s26 }
 0x203   : > { %1672 = vmatprep.subr.msk.bf16.mxu1 %vm683_vm2, %v1265_v42  ;;  %v1291_v29 = vsel %vm683_vm2, %v1265_v42, 0  ;;  %s1819_s28 = scalar_lea.vmem %s1818_s26, 2048  ;;  %p1820_p13 = scmp.lt.s32.totalorder %s2418_s12, %s1818_s26 }
 0x204   : > { %1660 = vmatpush3.bf16.msra.mxu1 %v1291_v29  ;;  %p1821_p0 = scmp.lt.s32.totalorder %s1819_s28, %s1813_s30 }
 0x206   : > { %1066 = vrot.lane.b32.xlu0 %v1050_v45, %s1941_s22  ;;  %1242 = vrot.lane.b32.xlu1 %v1561_v44, %s1941_s22  ;;  %p1822_p3 = por %p1821_p0, %p1820_p13 }
 0x208   : > { %p1823_p1 = pnand %p1822_p3, %p1816_p11 }
 0x20a   : > { %1076 = vrot.lane.b32.xlu1 %v1028_v46, %s1941_s22 }
 0x20e   : > { %1080 = vrot.lane.b32.xlu1 %v1026_v47, %s1941_s22 }
 0x25a   : > { %v1119_v49 = vpop.permute.xlu0 %1118 }
 0x25b   : > { %v1140_v61 = vrot.slane %v1119_v49, 1 }
 0x25c   : > { %v1115_v50 = vpop.permute.xlu1 %1114 }
 0x25d   : > { %v1138_v18 = vrot.slane %v1115_v50, 1 }
 0x260   : > { %v1121_v54 = vpop.permute.xlu1 %1120  ;;  %v1117_v55 = vpop.permute.xlu0 %1116 }
 0x261   : > { %v1141_v62 = vrot.slane %v1121_v54, 1  ;;  %v1139_v1 = vrot.slane %v1117_v55, 1 }
 0x263   : > { %v1151_v5 = vsel %vm1146_vm10, %v1140_v61, %v1141_v62  ;;  %v1152_v6 = vsel %vm1146_vm10, %v1139_v1, %v1140_v61  ;;  %v1153_v24 = vsel %vm1146_vm10, %v1138_v18, %v1139_v1 }
 0x264   : > { %v1123_v9 = vpop.permute.xlu0 %1122  ;;  %1191 = vrot.lane.b32.xlu0 %v1151_v5, %s1941_s22  ;;  %v1172_v10 = vsel %vm2321_vm11, %v1152_v6, 0.0 }
 0x265   : > { %v1142_v19 = vrot.slane %v1123_v9, 1  ;;  %1189 = vrot.lane.b32.xlu1 %v1172_v10, %s1941_s22 }
 0x267   : > { %v1150_v25 = vsel %vm1146_vm10, %v1141_v62, %v1142_v19 }
 0x268   : > { %v1127_v27 = vpop.permute.xlu0 %1126  ;;  %1187 = vrot.lane.b32.xlu0 %v1153_v24, %s1941_s22  ;;  %v1125_v28 = vpop.permute.xlu1 %1124  ;;  %v1174_v30 = vsel %vm2334_vm12, %v1150_v25, 0.0 }
 0x269   : > { %v1144_v33 = vrot.slane %v1127_v27, 1  ;;  %v1143_v34 = vrot.slane %v1125_v28, 1  ;;  %1193 = vrot.lane.b32.xlu1 %v1174_v30, %s1941_s22 }
 0x26b   : > { %v1148_v36 = vsel %vm1146_vm10, %v1143_v34, %v1144_v33  ;;  %v1149_v40 = vsel %vm1146_vm10, %v1142_v19, %v1143_v34 }
 0x26c   : > { %v1129_v37 = vpop.permute.xlu1 %1128  ;;  %1078 = vrot.lane.b32.xlu0 %v1056_v35, %s1941_s22  ;;  %v1176_v38 = vsel %vm1103_vm14, %v1148_v36, 0.0  ;;  %v1071_v45 = vpop.permute.xlu0 %1070 }
 0x26d   : > { %v1145_v39 = vrot.slane %v1129_v37, 1  ;;  %1197 = vrot.lane.b32.xlu1 %v1176_v38, %s1941_s22  ;;  %v1092_v54 = vadd.f32 %v1071_v45, %v2239_v53 }
 0x26f   : > { %v1154_v41 = vsel %vm1146_vm10, %v1145_v39, %v1138_v18  ;;  %v1147_v43 = vsel %vm1146_vm10, %v1144_v33, %v1145_v39 }
 0x270   : > { %1195 = vrot.lane.b32.xlu0 %v1149_v40, %s1941_s22  ;;  %v1178_v32 = vsel %vm1105_vm15, %v1154_v41, 0.0  ;;  %v1069_v44 = vpop.permute.xlu1 %1068  ;;  %v1226_v47 = vpop.permute.xlu0 %1225 }
 0x271   : > { %1201 = vrot.lane.b32.xlu1 %v1178_v32, %s1941_s22  ;;  %v1091_v55 = vadd.f32 %v1069_v44, %v2251_v0 }
 0x274   : > { %1199 = vrot.lane.b32.xlu0 %v1147_v43, %s1941_s22  ;;  %v1073_v46 = vpop.permute.xlu1 %1072  ;;  %v1075_v49 = vpop.permute.xlu0 %1074 }
 0x275   : > { %v1093_v62 = vadd.f32 %v1073_v46, %v2249_v63 }
 0x278   : > { %v1243_v48 = vpop.permute.xlu1 %1242  ;;  %v1067_v51 = vpop.permute.xlu0 %1066 }
 0x279   : > { %v1090_v61 = vadd.f32 %v1067_v51, %v2241_v56  ;;  %v1094_v56 = vadd.f32 %v1075_v49, %v2258_v13 }
 0x27c   : > { %v1077_v50 = vpop.permute.xlu1 %1076 }
 0x27d   : > { %v1095_v53 = vadd.f32 %v1077_v50, %v2266_v23 }
 0x280   : > { %v1081_v52 = vpop.permute.xlu1 %1080 }
 0x281   : > { %v1097_v28 = vadd.f32 %v1081_v52, %v2278_v31 }
 0x2d6   : > { %v1192_v57 = vpop.permute.xlu0 %1191 }
 0x2d7   : > { %v1213_v59 = vadd.f32 %v1192_v57, %v1092_v54  ;;  %v1190_v58 = vpop.permute.xlu1 %1189 }
 0x2d8   : > { %v1212_v60 = vadd.f32 %v1190_v58, %v1091_v55 }
 0x2d9   : > { %v1230_v1 = vmul.f32 %v1226_v47, %v1213_v59  ;;  %v1567_v59 = vld [vmem:[%s2525_s24] ss:$0 sm:$0xff]  ;;  %s2426_s24 = scalar_lea.sflag [#allocation4], %s389_s7 }
 0x2da   : > { %v1229_v4 = vmul.f32 %v1226_v47, %v1212_v60  ;;  %v1188_v5 = vpop.permute.xlu0 %1187 }
 0x2db   : > { %v1211_v6 = vadd.f32 %v1188_v5, %v1090_v61  ;;  %v1194_v9 = vpop.permute.xlu1 %1193  ;;  %v1247_v18 = vadd.f32 %v1243_v48, %v1230_v1 }
 0x2dc   : > { %v1214_v10 = vadd.f32 %v1194_v9, %v1093_v62  ;;  %v1246_v14 = vadd.f32 %v1243_v48, %v1229_v4 }
 0x2dd   : > { %v1228_v15 = vmul.f32 %v1226_v47, %v1211_v6  ;;  %v1255_v30 = vmax.f32 %v1247_v18, 0.0 }
 0x2de   : > { %v1231_v0 = vmul.f32 %v1226_v47, %v1214_v10  ;;  %v1079_v19 = vpop.permute.xlu0 %1078  ;;  %v1254_v63 = vmax.f32 %v1246_v14, 0.0 }
 0x2df   : > { %v1245_v21 = vadd.f32 %v1243_v48, %v1228_v15  ;;  %v1198_v22 = vpop.permute.xlu1 %1197  ;;  %v1096_v39 = vadd.f32 %v1079_v19, %v2261_v20 }
 0x2e0   : > { %v1248_v24 = vadd.f32 %v1243_v48, %v1231_v0  ;;  %v1216_v25 = vadd.f32 %v1198_v22, %v1095_v53 }
 0x2e1   : > { %v1253_v27 = vmax.f32 %v1245_v21, 0.0 }
 0x2e2   : > { %v1256_v33 = vmax.f32 %v1248_v24, 0.0  ;;  %v1233_v34 = vmul.f32 %v1226_v47, %v1216_v25  ;;  %v1196_v26 = vpop.permute.xlu0 %1195 }
 0x2e3   : > { %v1215_v35 = vadd.f32 %v1196_v26, %v1094_v56  ;;  %v1202_v36 = vpop.permute.xlu1 %1201  ;;  %v1261_v23 = vpack.c.bf16 %v1254_v63, %v1253_v27 }
 0x2e4   : > { %v1218_v37 = vadd.f32 %v1202_v36, %v1097_v28  ;;  %v1262_v38 = vpack.c.bf16 %v1256_v33, %v1255_v30  ;;  %v1250_v40 = vadd.f32 %v1243_v48, %v1233_v34 }
 0x2e5   : > { %v1232_v41 = vmul.f32 %v1226_v47, %v1215_v35  ;;  %1270 = vrot.lane.b32.xlu0 %v1261_v23, %s1942_s11 }
 0x2e6   : > { %v1235_v13 = vmul.f32 %v1226_v47, %v1218_v37  ;;  %1272 = vrot.lane.b32.xlu1 %v1262_v38, %s1942_s11  ;;  %v1200_v32 = vpop.permute.xlu0 %1199  ;;  %v1258_v29 = vmax.f32 %v1250_v40, 0.0 }
 0x2e7   : > { %v1249_v42 = vadd.f32 %v1243_v48, %v1232_v41  ;;  %v1217_v31 = vadd.f32 %v1200_v32, %v1096_v39 }
 0x2e8   : > { %v1252_v44 = vadd.f32 %v1243_v48, %v1235_v13 }
 0x2e9   : > { %v1257_v43 = vmax.f32 %v1249_v42, 0.0  ;;  %v1234_v45 = vmul.f32 %v1226_v47, %v1217_v31  ;;  %v1566_v47 = vld [vmem:[%s2524_s10] ss:$0 sm:$0xff] }
 0x2ea   : > { %v1260_v50 = vmax.f32 %v1252_v44, 0.0 }
 0x2eb   : > { %v1251_v46 = vadd.f32 %v1243_v48, %v1234_v45  ;;  %v1263_v49 = vpack.c.bf16 %v1258_v29, %v1257_v43 }
 0x2ed   : > { %v1259_v51 = vmax.f32 %v1251_v46, 0.0  ;;  %1274 = vrot.lane.b32.xlu0 %v1263_v49, %s1942_s11 }
 0x2ef   : > { %v1264_v20 = vpack.c.bf16 %v1260_v50, %v1259_v51 }
 0x2f1   : > { %1276 = vrot.lane.b32.xlu1 %v1264_v20, %s1942_s11  ;;  %s1572_s11 = sshll.u32 %s1426_s25, 7 }
 0x2f2   : > { %s2416_s22 = scalar_lea.hbm %s2528_s29, %s1572_s11 }
 0x357   : > { %v1271_v52 = vpop.permute.xlu0 %1270 }
 0x358   : > { %v1273_v54 = vpop.permute.xlu1 %1272  ;;  %1661 = vmatprep.mubr.msk.bf16.mxu1 %vm670_vm4, %v1271_v52 }
 0x359   : > { %1662 = vmatmul.mubr.msk.bf16.vlgmr.msra.gmra.mxu1 %vm670_vm4, %v1273_v54 }
 0x35f   : > { %v1275_v55 = vpop.permute.xlu0 %1274 }
 0x360   : > { %1665 = vmatprep.mubr.msk.bf16.mxu1 %vm670_vm4, %v1275_v55 }
 0x363   : > { %v1277_v57 = vpop.permute.xlu1 %1276 }
 0x364   : > { %1666 = vmatmul.mubr.msk.bf16.gmra.mxu1 %vm670_vm4, %v1277_v57 }
 0x419   : > { %v1663_v48 = vpop.f32.mrf.mxu1 }
 0x41a   : > { %v1367_v58 = vmul.f32 %v1663_v48, %v1566_v47 }
 0x41b   : > { %v1327_v60 = vpop.f32.mrf.mxu1 }
 0x41c   : > { %v1382_v61 = vadd.f32 %v1567_v59, %v1367_v58  ;;  %v1365_v62 = vmul.f32 %v1566_v47, %v1327_v60 }
 0x41d   : > { %v1664_v1 = vpop.f32.mrf.mxu1 }
 0x41e   : > { %v1390_v4 = vadd.f32 %v1382_v61, %v2145_v7  ;;  %v1380_v5 = vadd.f32 %v1567_v59, %v1365_v62  ;;  %v1368_v6 = vmul.f32 %v1664_v1, %v1566_v47 }
 0x41f   : > { %v1330_v9 = vpop.f32.mrf.mxu1 }
 0x420   : > { %v1398_v10 = vmax.f32 %v1390_v4, 0.0  ;;  %v1388_v14 = vadd.f32 %v1380_v5, %v2137_v2  ;;  %v1383_v15 = vadd.f32 %v1567_v59, %v1368_v6  ;;  %v1366_v53 = vmul.f32 %v1566_v47, %v1330_v9 }
 0x422   : > { %1406 = vst.msk [vmem:[%s2390_s16 + $0x10] sm:$0xff] %vm429_vm1, %v1398_v10  ;;  %v1396_v18 = vmax.f32 %v1388_v14, 0.0  ;;  %v1391_v7 = vadd.f32 %v1383_v15, %v2148_v8  ;;  %v1381_v0 = vadd.f32 %v1567_v59, %v1366_v53 }
 0x424   : > { %1404 = vst.msk [vmem:[%s2390_s16] sm:$0xff] %vm429_vm1, %v1396_v18  ;;  %v1399_v19 = vmax.f32 %v1391_v7, 0.0  ;;  %v1389_v2 = vadd.f32 %v1381_v0, %v2140_v3  ;;  %v1667_v21 = vpop.f32.mrf.mxu1 }
 0x425   : > { %v1371_v22 = vmul.f32 %v1667_v21, %v1566_v47 }
 0x426   : > { %1407 = vst.msk [vmem:[%s2390_s16 + $0x18] sm:$0xff] %vm429_vm1, %v1399_v19  ;;  %v1397_v24 = vmax.f32 %v1389_v2, 0.0  ;;  %v1343_v25 = vpop.f32.mrf.mxu1 }
 0x427   : > { %v1386_v56 = vadd.f32 %v1567_v59, %v1371_v22  ;;  %v1369_v63 = vmul.f32 %v1566_v47, %v1343_v25 }
 0x428   : > { %1405 = vst.msk [vmem:[%s2390_s16 + $0x8] sm:$0xff] %vm429_vm1, %v1397_v24  ;;  %v1668_v8 = vpop.f32.mrf.mxu1 }
 0x429   : > { %v1394_v27 = vadd.f32 %v1386_v56, %v2166_v16  ;;  %v1384_v28 = vadd.f32 %v1567_v59, %v1369_v63  ;;  %v1372_v3 = vmul.f32 %v1668_v8, %v1566_v47 }
 0x42a   : > { %v1346_v30 = vpop.f32.mrf.mxu1 }
 0x42b   : > { %v1402_v33 = vmax.f32 %v1394_v27, 0.0  ;;  %v1392_v34 = vadd.f32 %v1384_v28, %v2153_v11  ;;  %v1387_v26 = vadd.f32 %v1567_v59, %v1372_v3  ;;  %v1370_v35 = vmul.f32 %v1566_v47, %v1346_v30 }
 0x42d   : > { %1410 = vst.msk [vmem:[%s2390_s16 + $0x30] sm:$0xff] %vm429_vm1, %v1402_v33  ;;  %v1400_v36 = vmax.f32 %v1392_v34, 0.0  ;;  %v1395_v23 = vadd.f32 %v1387_v26, %v2169_v17  ;;  %v1385_v37 = vadd.f32 %v1567_v59, %v1370_v35 }
 0x42f   : > { %1408 = vst.msk [vmem:[%s2390_s16 + $0x20] sm:$0xff] %vm429_vm1, %v1400_v36  ;;  %v1403_v16 = vmax.f32 %v1395_v23, 0.0  ;;  %v1393_v38 = vadd.f32 %v1385_v37, %v2156_v12 }
 0x431   : > { %1411 = vst.msk [vmem:[%s2390_s16 + $0x38] sm:$0xff] %vm429_vm1, %v1403_v16  ;;  %v1401_v11 = vmax.f32 %v1393_v38, 0.0 }
 0x433   : > { %1409 = vst.msk [vmem:[%s2390_s16 + $0x28] sm:$0xff] %vm429_vm1, %v1401_v11 }
 0x434   : > { %1826 = shalt.err (!%p1823_p1)
}
 0x435   : > { %s1827_s7 = scalar_lea.hbm %s2416_s22, 1024  ;;  %s1831_s11 = scalar_lea.hbm %s2528_s29, 8192 }
 0x436   : > { %p1828_p6 = scmp.ne.s32.totalorder %s2416_s22, %s1827_s7  ;;  %p1832_p5 = scmp.lt.s32.totalorder %s2416_s22, %s2528_s29 }
 0x437   : > { %p1833_p8 = scmp.lt.s32.totalorder %s1831_s11, %s1827_s7 }
 0x438   : > { %p1829_p4 = pnand %p1828_p6, %p2083_p12 }
 0x439   : > { %p1834_p9 = por %p1833_p8, %p1832_p5 }
 0x43a   : > { %p1830_p7 = pneg %p1829_p4 }
 0x43c   : > { %p1835_p10 = pnand %p1834_p9, %p1830_p7 }
 0x43e   : > { %1838 = shalt.err (!%p1835_p10)
}
 0x43f   : > { %s1944_s30 = smov 128   ;;  %s1945_s8 = smov 8  }
 0x440   : > { %1675 = dma.vmem_to_hbm [thread:$0]  (%p2083_p12), %s2418_s12, 1024, %s2416_s22, %s2426_s24, %s1944_s30, %s1944_s30, %s1945_s8  }
 0x441 PF: > { %p1686_p11 = scmp.ge.s32.totalorder %s1933_s23, 2  ;;  %s1444_s26 = sand.u32 1, %s1893_s13  }
 0x442   : > { %s1445_s28 = scalar_lea.sflag [#allocation4], %s1444_s26 }
 0x443   : > { %p1682_p13 = pnand %p1686_p11, %p2096_p2 }
 0x445   : > { %p1683_p0 = pneg %p1682_p13 }
 0x447   : > { %1888 = dma.done.wait (%p1683_p0), %s1445_s28, 1024  }
 0x448   : > { %1890 = vsyncadd (%p1683_p0), %s1445_s28, 4294966272  ;;  %s26_s23 = sadd.s32 1, %s1933_s23   ;;  %s2529_s19 = sld [smem:[#allocation9_spill]] }
 0x449   : > { %p23_p3 = scmp.ge.s32.totalorder %s26_s23, 10   ;;  %s2530_s12 = sld [smem:[#allocation10_spill]] }
 0x44a   : > { %s2531_s22 = sld [smem:[#allocation11_spill]]  ;;  %s2533_s13 = smov %s1897_s14 }
 0x44b   : > { %s2532_s24 = sld [smem:[#allocation12_spill]]  ;;  %s2534_s14 = smov %s1901_s15 }
 0x44c   : > { %s2535_s15 = smov %s2091_s20  ;;  %s2536_s16 = smov %s1909_s17 }
 0x44d   : > { %s2537_s17 = smov %s1913_s18  ;;  %s2538_s18 = smov %s2088_s21 }
 0x44e   :  { %25 = sbr.rel (!%p23_p3) target bundleno = 14 (0xe), region = 110 }
 0x44f   : > { %s2539_s20 = smov %s2530_s12 }
 0x450   : > { %s2540_s21 = smov %s2531_s22 }
 0x451   : > { %s2541_s22 = smov %s2532_s24 }
 0x453   :  { %1450 = vsyncpa [#allocation3], 1 }
 0x454   :  { %1452 = vsyncpa [#allocation3 + $0x1], 1 }
 0x455   :  { %1453 = vsyncpa [#allocation4], 1 }
 0x456   :  { %1455 = vsyncpa [#allocation4 + $0x1], 1 }

</bundles_post_ra>
